<compile_context>
chip_gen: v6e
topology: v6e:2x2x1
jax: 0.10.0
libtpu: 0.0.40
codegen_flags: <defaults>
</compile_context>

<pallas_src>
import jax
import jax.numpy as jnp
from jax.experimental import pallas as pl
from jax.experimental.pallas import tpu as pltpu


def _round_up(a, m):
    return ((a + m - 1) // m) * m


# ------------------------------------------------------------------ kernels --

def _score_kernel(x_ref, w_ref, b_ref, o_ref):
    # x: (TN, C) VMEM, w: (1, C) VMEM, b: (1,) SMEM scalar, o: (TN, 1) f32
    x = x_ref[...].astype(jnp.float32)
    w = w_ref[...].astype(jnp.float32)            # (1, C) broadcasts over rows
    o_ref[...] = jnp.sum(x * w, axis=-1, keepdims=True) + b_ref[0]


def _gather_scale_kernel(perm_ref, s_ref, x_hbm, o_ref, buf, sems):
    # perm_ref: (K_pad,) int32 in SMEM (row indices to gather)
    # s_ref:    (BK, 1) f32 block of relu(score)[perm]
    # x_hbm:    (N, C) left in HBM (memory_space=pl.ANY)
    # o_ref:    (BK, C) output block
    # buf:      (2, BK, C) VMEM double buffer; sems: (2, BK) DMA semaphores
    i = pl.program_id(0)
    n = pl.num_programs(0)
    bk = o_ref.shape[0]
    slot = i % 2

    def fetch(step, slot_):
        base = step * bk
        for j in range(bk):                       # static unroll, bk is small
            row = perm_ref[base + j]
            pltpu.make_async_copy(
                x_hbm.at[pl.ds(row, 1), :],
                buf.at[slot_, pl.ds(j, 1), :],
                sems.at[slot_, j],
            ).start()

    # Prime the pipeline on the very first step.
    @pl.when(i == 0)
    def _():
        fetch(0, 0)

    # Prefetch the next block (other slot) before waiting on this one.
    @pl.when(i + 1 < n)
    def _():
        fetch(i + 1, 1 - slot)

    # Wait for this step's BK row DMAs to land.
    for j in range(bk):
        pltpu.make_async_copy(
            x_hbm.at[pl.ds(0, 1), :],
            buf.at[slot, pl.ds(j, 1), :],
            sems.at[slot, j],
        ).wait()

    rows = buf[slot].astype(jnp.float32)          # (BK, C)
    o_ref[...] = (rows * s_ref[...]).astype(o_ref.dtype)


# ----------------------------------------------------------------- wrappers --

def compute_scores(x, w_row, b_vec, *, max_tile_bytes=4 * 1024 * 1024):
    """score = x @ w + b, computed as an N-tiled VPU kernel.  Returns [N] f32."""
    N, C = x.shape
    # Largest (TILE_N, C) f32 tile <= max_tile_bytes, rows a multiple of 8.
    # 2 x 4 MiB double-buffered input tiles stay well under the 32 MiB scoped
    # VMEM default on v5e/v6e/v7x (v7x has only 64 MiB physical VMEM).
    tn = max(8, min(1024, (max_tile_bytes // (C * 4)) // 8 * 8))
    tn = min(tn, _round_up(N, 8))
    n_pad = _round_up(N, tn)
    x_p = jnp.pad(x, ((0, n_pad - N), (0, 0))) if n_pad != N else x

    out = pl.pallas_call(
        _score_kernel,
        out_shape=jax.ShapeDtypeStruct((n_pad, 1), jnp.float32),
        grid=(n_pad // tn,),
        in_specs=[
            pl.BlockSpec((tn, C), lambda i: (i, 0)),
            pl.BlockSpec((1, C), lambda i: (0, 0)),
            pl.BlockSpec(memory_space=pltpu.MemorySpace.SMEM),   # bias scalar
        ],
        out_specs=pl.BlockSpec((tn, 1), lambda i: (i, 0)),
        compiler_params=pltpu.CompilerParams(
            dimension_semantics=("parallel",),        # megacore sharding on v7x
            vmem_limit_bytes=32 * 1024 * 1024,
        ),
    )(x_p, w_row, b_vec)
    return out[:N, 0]


def gather_and_scale(x, perm, scale, *, block_rows=32):
    """x: [N, C], perm: [K] int32, scale: [K, 1] f32 -> x[perm] * scale, [K, C]."""
    N, C = x.shape
    K = perm.shape[0]
    bk = min(block_rows, _round_up(K, 8))         # rows per grid step (mult of 8)
    k_pad = _round_up(K, bk)
    if k_pad != K:
        perm = jnp.pad(perm, (0, k_pad - K))      # pad with row 0 (valid index)
        scale = jnp.pad(scale, ((0, k_pad - K), (0, 0)))  # padded scale = 0

    # TODO(synk): for very large K the whole perm array in SMEM may exceed SMEM
    # capacity; it would then need to be blocked into per-step SMEM tiles.
    out = pl.pallas_call(
        _gather_scale_kernel,
        out_shape=jax.ShapeDtypeStruct((k_pad, C), x.dtype),
        grid=(k_pad // bk,),
        in_specs=[
            pl.BlockSpec(memory_space=pltpu.MemorySpace.SMEM),   # perm
            pl.BlockSpec((bk, 1), lambda i: (i, 0)),             # scale block
            pl.BlockSpec(memory_space=pl.ANY),                   # x stays in HBM
        ],
        out_specs=pl.BlockSpec((bk, C), lambda i: (i, 0)),
        scratch_shapes=[
            pltpu.VMEM((2, bk, C), x.dtype),
            pltpu.SemaphoreType.DMA((2, bk)),
        ],
        # "arbitrary": the manual double-buffer carries state across steps, so
        # the axis must execute sequentially on one core.
        compiler_params=pltpu.CompilerParams(
            dimension_semantics=("arbitrary",),
            vmem_limit_bytes=32 * 1024 * 1024,
        ),
    )(perm.astype(jnp.int32), scale.astype(jnp.float32), x)
    return out[:K]


def sag_pooling_forward(x, edge_index, w, b, ratio=0.5, edge_attr=None, batch=None):
    """Mirror of SAGPooling.forward (Linear scorer + ReLU + global top-k).

    Returns (x_pooled, edge_index_filtered, edge_attr, batch_pooled, edge_mask).
    """
    N, C = x.shape
    if batch is None:
        batch = jnp.zeros((N,), dtype=edge_index.dtype)

    w_row = jnp.reshape(w, (1, C)).astype(jnp.float32)
    b_vec = jnp.reshape(b, (-1,))[:1].astype(jnp.float32)

    # 1) score = Linear(x).squeeze()          (Pallas, tiled over N)
    score = compute_scores(x, w_row, b_vec)                  # [N] f32

    # 2) topk: keep max(1, int(ratio * N)) highest-scoring nodes (global, as in
    #    the reference module's topk which ignores `batch`).
    num_keep = max(1, int(ratio * N))                        # static
    _, perm = jax.lax.top_k(score, num_keep)
    perm = perm.astype(jnp.int32)

    # 3) x = x[perm] * relu(score[perm]).view(-1, 1)   (Pallas gather kernel)
    scale = jnp.maximum(score[perm], 0.0).reshape(num_keep, 1)
    x_pooled = gather_and_scale(x, perm, scale)

    # 4) batch = batch[perm]
    batch_pooled = batch[perm]

    # 5) filter_adj: keep edges with both endpoints kept, remap node ids.
    # TODO(synk): PyG compacts filtered edges to a dynamic-length array; JAX
    # needs static shapes, so dropped edges are marked -1 and a mask returned.
    new_idx = jnp.full((N,), -1, dtype=jnp.int32).at[perm].set(
        jnp.arange(num_keep, dtype=jnp.int32)
    )
    row, col = edge_index[0], edge_index[1]
    edge_mask = (new_idx[row] >= 0) & (new_idx[col] >= 0)
    edge_index_filtered = jnp.where(
        edge_mask[None, :],
        jnp.stack([new_idx[row], new_idx[col]], axis=0),
        -1,
    )
    if edge_attr is not None:
        edge_attr = jnp.where(edge_mask[:, None], edge_attr, 0)

    return x_pooled, edge_index_filtered, edge_attr, batch_pooled, edge_mask


# --------------------------------------------------------------------- main --

if __name__ == "__main__":
    N, C, E = 16, 32, 24
    ratio = 0.5

    key = jax.random.PRNGKey(0)
    kx, ke, kw, kb = jax.random.split(key, 4)

    x = jax.random.normal(kx, (N, C), dtype=jnp.float32)
    edge_index = jax.random.randint(ke, (2, E), 0, N, dtype=jnp.int32)

    # Deterministic "Linear(in_channels, 1)" params (synthetic init).
    w = jax.random.normal(kw, (C, 1), dtype=jnp.float32) * (1.0 / jnp.sqrt(C))
    b = jax.random.normal(kb, (1, 1), dtype=jnp.float32) * 0.01

    x_out, ei_out, ea_out, batch_out, emask = jax.block_until_ready(
        sag_pooling_forward(x, edge_index, w, b, ratio=ratio)
    )

    # Correctness check against a plain-JAX reference (same reduction style as
    # the kernel so tie-breaking in top_k matches).
    score_ref = jnp.sum(x * w[:, 0][None, :], axis=-1) + b[0, 0]
    num_keep = max(1, int(ratio * N))
    _, perm_ref = jax.lax.top_k(score_ref, num_keep)
    x_ref = x[perm_ref] * jnp.maximum(score_ref[perm_ref], 0.0)[:, None]

    assert x_out.shape == (num_keep, C)
    assert jnp.allclose(x_out, x_ref, atol=1e-5), "mismatch vs reference"
    assert batch_out.shape == (num_keep,)
    assert ei_out.shape == edge_index.shape

    print("KERNEL_OK")
</pallas_src>

<mosaic_0001>
module attributes {stable_mosaic.version = 11 : i64} {
  func.func @_score_kernel(%arg0: i32, %arg1: memref<16x32xf32, #tpu.memory_space<vmem>>, %arg2: memref<1x32xf32, #tpu.memory_space<vmem>>, %arg3: memref<1xf32, #tpu.memory_space<smem>>, %arg4: memref<16x1xf32, #tpu.memory_space<vmem>>) attributes {dimension_semantics = [#tpu.dimension_semantics<parallel>], iteration_bounds = array<i64: 1>, scalar_prefetch = 0 : i64, scratch_operands = 0 : i64, tpu.core_type = #tpu.core_type<tc>, window_params = [{transform_indices = @transform_0, window_bounds = array<i64: 16, 32>}, {pipeline_mode = #tpu.pipeline_mode<synchronous>, transform_indices = @transform_1, window_bounds = array<i64: 1, 32>}, {transform_indices = @transform_2, window_bounds = array<i64: 1>}, {transform_indices = @transform_3, window_bounds = array<i64: 16, 1>}]} {
    %c0 = arith.constant 0 : index
    %c0_0 = arith.constant 0 : index
    %0 = vector.load %arg1[%c0, %c0_0] : memref<16x32xf32, #tpu.memory_space<vmem>>, vector<16x32xf32>
    %c0_1 = arith.constant 0 : index
    %c0_2 = arith.constant 0 : index
    %1 = vector.load %arg2[%c0_1, %c0_2] : memref<1x32xf32, #tpu.memory_space<vmem>>, vector<1x32xf32>
    %2 = vector.broadcast %1 : vector<1x32xf32> to vector<16x32xf32>
    %3 = arith.mulf %0, %2 : vector<16x32xf32>
    %cst = arith.constant dense<0.000000e+00> : vector<16xf32>
    %4 = vector.multi_reduction <add>, %3, %cst [1] : vector<16x32xf32> to vector<16xf32>
    %5 = vector.shape_cast %4 : vector<16xf32> to vector<16x1xf32>
    %c0_3 = arith.constant 0 : index
    %6 = memref.load %arg3[%c0_3] : memref<1xf32, #tpu.memory_space<smem>>
    %7 = vector.broadcast %6 : f32 to vector<16x1xf32>
    %8 = arith.addf %5, %7 : vector<16x1xf32>
    %c0_4 = arith.constant 0 : index
    %c0_5 = arith.constant 0 : index
    %9 = vector.load %arg4[%c0_4, %c0_5] : memref<16x1xf32, #tpu.memory_space<vmem>>, vector<16x1xf32>
    tpu.vector_store %arg4[%c0_4, %c0_5], %8 {strides = array<i32>} : memref<16x1xf32, #tpu.memory_space<vmem>>, vector<16x1xf32>,
    return
  }
  func.func @transform_0(%arg0: i32) -> (i32, i32) {
    %c0_i32 = arith.constant 0 : i32
    %c0_i32_0 = arith.constant 0 : i32
    return %arg0, %c0_i32 : i32, i32
  }
  func.func @transform_1(%arg0: i32) -> (i32, i32) {
    %c0_i32 = arith.constant 0 : i32
    %c0_i32_0 = arith.constant 0 : i32
    %c0_i32_1 = arith.constant 0 : i32
    return %c0_i32, %c0_i32_0 : i32, i32
  }
  func.func @transform_2(%arg0: i32) -> i32 {
    %c0_i32 = arith.constant 0 : i32
    %c0_i32_0 = arith.constant 0 : i32
    return %c0_i32 : i32
  }
  func.func @transform_3(%arg0: i32) -> (i32, i32) {
    %c0_i32 = arith.constant 0 : i32
    %c0_i32_0 = arith.constant 0 : i32
    return %arg0, %c0_i32 : i32, i32
  }
}

</mosaic_0001>

<bundles_post_ra>
// kernel: tpu_custom_call.1
= control target key start
LH: loop header
LB: loop body
LE: loop exit
PB: predicated region body
PF: predicated region fallthrough
CT: control target
= control target key end

     0   :  { %9 = vsyncpa [#allocation4], 0  ;;  %s85_s12 = smov [#allocation3]   ;;  %s123_s0 = inlined_call_operand.hbm [shape: f32[16,32], index: 0, kind: input, shape index: {}]   ;;  %s124_s1 = inlined_call_operand.vmem [shape: f32[1,32], index: 1, kind: input, shape index: {}]   ;;  %s125_s2 = inlined_call_operand.<no memory space> [shape: f32[1], index: 2, kind: input, shape index: {}]   ;;  %s126_s3 = inlined_call_operand.vmem [shape: f32[16,1], index: 3, kind: output, shape index: {}]  }
   0x1   :  { %s15_s13 = sshll.u32 %s85_s12, 4  ;;  %s16_s13 = int_to_ptr.vmem [resolvable:$true] %s15_s13 }
   0x2   :  { %s71_s14 = scalar_lea.vmem %s16_s13, 256  ;;  %p76_p1 = scmp.lt.s32.totalorder %s16_s13, %s16_s13 }
   0x3   :  { %p72_p0 = scmp.ne.s32.totalorder %s16_s13, %s71_s14  ;;  %p77_p2 = scmp.lt.s32.totalorder %s71_s14, %s71_s14 }
   0x5   :  { %p78_p3 = por %p77_p2, %p76_p1 }
   0x7   :  { %p79_p4 = pnand %p78_p3, %p72_p0 }
   0x9   :  { %82 = shalt.err (!%p79_p4)
}
   0xa   :  { %s86_s15 = smov 128   ;;  %s87_s16 = smov 8  }
   0xb   :  { %21 = dma.hbm_to_vmem [thread:$0]  %s123_s0, 256, %s16_s13, [#allocation4], %s86_s15, %s86_s15, %s87_s16  }
   0xc   :  { %83 = dma.done.wait [#allocation4], 256  }
   0xd   :  { %84 = vsyncadd [#allocation4], 4294967040  ;;  %v29_v0 = vld [vmem:[#allocation3] sm:$0xff]  ;;  %vm40_vm0 = vcmask 261120   ;;  %v30_v2 = vld [vmem:[#allocation3 + $0x8] sm:$0xff]  ;;  %v48_v7 = vstv %s125_s2  ;;  %vm51_vm1 = vcmask 7168  }
   0xe   :  { %v59_v1 = vld [vmem:[%s124_s1] ss:$0 sm:$0xff] }
   0xf   :  { %v38_v3 = vmul.f32 %v59_v1, %v29_v0  ;;  %v39_v4 = vmul.f32 %v59_v1, %v30_v2 }
  0x11   :  { %v41_v5 = vsel %vm40_vm0, %v38_v3, 0.0  ;;  %v44_v6 = vsel %vm40_vm0, %v39_v4, 0.0 }
  0x12   :  { %42 = vadd.xlane.f32.xlu0 %v41_v5 }
  0x16   :  { %45 = vadd.xlane.f32.xlu0 %v44_v6 }
  0x9b   :  { %v43_v8 = vpop.xlane.xlu0 %42 }
  0x9c   :  { %v49_v9 = vadd.f32 %v48_v7, %v43_v8 }
  0x9e   :  { %52 = vst.msk [vmem:[%s126_s3] sm:$0xff] %vm51_vm1, %v49_v9 }
  0x9f   :  { %v46_v10 = vpop.xlane.xlu0 %45 }
  0xa0   :  { %v50_v11 = vadd.f32 %v48_v7, %v46_v10 }
  0xa2   :  { %53 = vst.msk [vmem:[%s126_s3 + $0x8] sm:$0xff] %vm51_vm1, %v50_v11 }
  0xa3   :  { %58 = vsyncpa [#allocation4], 1 }

</bundles_post_ra>
